<compile_context>
chip_gen: v7x
topology: tpu7x:2x2x1
jax: 0.10.0
libtpu: 0.0.40
codegen_flags: <defaults>
</compile_context>

<pallas_src>
import functools

import jax
import jax.numpy as jnp
from jax import lax
from jax.experimental import pallas as pl
from jax.experimental.pallas import tpu as pltpu

K = 3          # ConvTranspose2d kernel size
EPS = 1e-5     # BatchNorm2d eps (PyTorch default)

# (tap, phase) -> (kh, kw) of the ConvTranspose2d weight w_t[cin, cout, kh, kw]
#   taps  : 0=(i,j) 1=(i,j+1) 2=(i+1,j) 3=(i+1,j+1)  on the ORIGINAL H x W grid
#   phases: 0=(even row, even col) 1=(even,odd) 2=(odd,even) 3=(odd,odd) of the 2H x 2W output
_TAP_PHASE_TO_KHW = {
    (0, 0): (1, 1),
    (0, 1): (1, 2), (1, 1): (1, 0),
    (0, 2): (2, 1), (2, 2): (0, 1),
    (0, 3): (2, 2), (1, 3): (2, 0), (2, 3): (0, 2), (3, 3): (0, 0),
}


def _pick_vmem_limit(bytes_needed):
    """Generation-aware VMEM limit: ~75% of physical (64 MiB v7x, 128 MiB v5e/v6e)."""
    cap = 64 * 1024 * 1024
    try:
        cap = int(getattr(pltpu.get_tpu_info(), "vmem_capacity_bytes", cap)) or cap
    except Exception:
        pass
    hi = (cap * 3) // 4
    want = max(2 * int(bytes_needed), 32 * 1024 * 1024)
    return int(min(want, hi))


def _conv_stats_kernel(wx_ref, we_ref, x_ref, e_ref, y_ref, stats_ref, *, H, W):
    """Pass 1 (one image per grid step): sub-pixel transposed conv + BN partial sums.

    The 4 spatial taps are built in-kernel from the flattened (C, H*W) tile with
    static lane shifts; boundary masks reproduce the implicit zero padding at the
    bottom / right edge of the image (output_padding side).  8 small MXU dots
    (4 taps x {x, encode_x}) accumulate into an f32 (4*Cout, H*W) register tile.
    """
    M = H * W
    PC = y_ref.shape[1]
    lane = lax.broadcasted_iota(jnp.int32, (1, M), 1)
    has_right = (lane % W) < (W - 1)       # column j+1 exists (else zero pad)
    has_below = lane < (H - 1) * W         # row    i+1 exists (else zero pad)

    def tap(src, d, mask):
        # value at flattened index l+d (zeros past the end), then zeroed wherever the
        # true 2-D neighbour lands in the zero padding (last column / last row).
        sh = jnp.concatenate(
            [src[:, d:], jnp.zeros((src.shape[0], d), src.dtype)], axis=1)
        return jnp.where(mask, sh, jnp.zeros_like(sh))

    acc = jnp.zeros((PC, M), jnp.float32)
    for src_ref, w_ref in ((x_ref, wx_ref), (e_ref, we_ref)):
        src = src_ref[0].astype(jnp.bfloat16)                    # (C, M) bf16 operands
        taps = (src,                                             # (i,   j)
                tap(src, 1, has_right),                          # (i,   j+1)
                tap(src, W, has_below),                          # (i+1, j)
                tap(src, W + 1, has_right & has_below))          # (i+1, j+1)
        for t in range(4):
            acc = acc + jnp.dot(w_ref[t].astype(jnp.bfloat16), taps[t],
                                preferred_element_type=jnp.float32)

    y_ref[0] = acc.astype(jnp.bfloat16)                          # lane-dense (PC, M)
    stats_ref[0, :, 0:1] = jnp.sum(acc, axis=1, keepdims=True)        # per-image sum
    stats_ref[0, :, 1:2] = jnp.sum(acc * acc, axis=1, keepdims=True)  # per-image sumsq


def _bn_relu_kernel(scale_ref, shift_ref, y_ref, o_ref):
    """Pass 2: elementwise fused BN affine + ReLU on the NCHW-ordered conv output."""
    o_ref[...] = jnp.maximum(
        y_ref[...].astype(jnp.float32) * scale_ref[...] + shift_ref[...], 0.0)


def decoder_block_forward(x, encode_x, w_t, b, gamma, beta):
    """x, encode_x: NCHW float32.  w_t: (Cin, Cout, K, K) PyTorch ConvTranspose2d layout.

    The conv bias `b` is accepted for API parity but unused: with training-mode
    BatchNorm a per-channel constant shift cancels in the mean subtraction and does
    not affect the variance (restore it if eval-mode / running-stats BN is needed).
    """
    del b
    N, C1, H, W = x.shape
    C2 = encode_x.shape[1]
    assert encode_x.shape[0] == N and encode_x.shape[2:] == (H, W)
    Cin = C1 + C2
    Cout = w_t.shape[1]
    OH, OW = 2 * H, 2 * W
    M = H * W                     # one matmul column per ORIGINAL-resolution pixel
    PC = 4 * Cout                 # (phase, out-channel) rows of the folded matmul
    NC = N * Cout

    # ---- fold the 9 transposed-conv taps into 4 per-tap (PC, Cin) weight blocks ----
    w_fold = jnp.zeros((4, PC, Cin), jnp.float32)
    for (tap, phase), (kh, kw) in _TAP_PHASE_TO_KHW.items():
        w_fold = w_fold.at[tap, phase * Cout:(phase + 1) * Cout, :].set(
            jnp.transpose(w_t[:, :, kh, kw]).astype(jnp.float32))
    wx = w_fold[:, :, :C1].astype(jnp.bfloat16)   # columns for x channels
    we = w_fold[:, :, C1:].astype(jnp.bfloat16)   # columns for encode_x channels

    # Inputs stay f32 in HBM and are read exactly once; bf16 cast, channel concat and
    # tap construction all happen inside the kernel (no xt / cat materialization).
    x3 = x.reshape(N, C1, M)
    e3 = encode_x.reshape(N, C2, M)

    vmem1 = _pick_vmem_limit(
        2 * Cin * M * 4            # double-buffered f32 input blocks
        + 2 * PC * M * 2           # double-buffered bf16 y output blocks
        + PC * M * 4               # f32 accumulator
        + 4 * Cin * M * 2          # live tap temporaries (bf16)
        + 4 * 4 * PC * Cin * 2     # folded weights
        + (1 << 20))

    # ---- pass 1: conv + per-image BN partial sums (both outputs per-image blocks) ----
    y_planar, stats = pl.pallas_call(
        functools.partial(_conv_stats_kernel, H=H, W=W),
        out_shape=(jax.ShapeDtypeStruct((N, PC, M), jnp.bfloat16),
                   jax.ShapeDtypeStruct((N, PC, 2), jnp.float32)),
        grid=(N,),
        in_specs=[pl.BlockSpec((4, PC, C1), lambda n: (0, 0, 0)),
                  pl.BlockSpec((4, PC, C2), lambda n: (0, 0, 0)),
                  pl.BlockSpec((1, C1, M), lambda n: (n, 0, 0)),
                  pl.BlockSpec((1, C2, M), lambda n: (n, 0, 0))],
        out_specs=(pl.BlockSpec((1, PC, M), lambda n: (n, 0, 0)),
                   pl.BlockSpec((1, PC, 2), lambda n: (n, 0, 0))),
        compiler_params=pltpu.CompilerParams(
            dimension_semantics=("parallel",),       # independent images -> 2 TCs on v7x
            vmem_limit_bytes=vmem1),
    )(wx, we, x3, e3)

    # ---- global BN statistics folded into per-channel scale / shift (tiny) ----------
    count = jnp.float32(N * OH * OW)
    ssum = jnp.sum(stats[:, :, 0], axis=0).reshape(4, Cout).sum(axis=0)
    ssq = jnp.sum(stats[:, :, 1], axis=0).reshape(4, Cout).sum(axis=0)
    mean = ssum / count
    var = jnp.maximum(ssq / count - mean * mean, 0.0)
    scale = gamma.astype(jnp.float32) * lax.rsqrt(var + EPS)
    shift = beta.astype(jnp.float32) - mean * scale
    scale_nc = jnp.tile(scale, N).reshape(NC, 1, 1)   # index n*Cout + c
    shift_nc = jnp.tile(shift, N).reshape(NC, 1, 1)

    # ---- phase interleave to NCHW on the bf16 conv output (one cheap XLA transpose) --
    ynchw = jnp.transpose(
        y_planar.reshape(N, 2, 2, Cout, H, W),        # (n, ph, pw, c, i, j)
        (0, 3, 4, 1, 5, 2)).reshape(NC, OH, OW)       # (n*c, 2i+ph, 2j+pw)

    # ---- pass 2: fused BN affine + ReLU, writes the final NCHW f32 output ------------
    if OH % 8 == 0:
        budget_rows = max(8, ((4 << 20) // (6 * OW)) // 8 * 8)   # ~4 MiB per block
        TR = min(OH, budget_rows)
    else:
        TR = OH                                                  # full dim is always legal
    n_rt = pl.cdiv(OH, TR)
    vmem2 = _pick_vmem_limit(2 * TR * OW * 2 + 2 * TR * OW * 4 + (1 << 20))

    out = pl.pallas_call(
        _bn_relu_kernel,
        out_shape=jax.ShapeDtypeStruct((NC, OH, OW), jnp.float32),
        grid=(NC, n_rt),
        in_specs=[pl.BlockSpec((1, 1, 1), lambda c, r: (c, 0, 0)),
                  pl.BlockSpec((1, 1, 1), lambda c, r: (c, 0, 0)),
                  pl.BlockSpec((1, TR, OW), lambda c, r: (c, r, 0))],
        out_specs=pl.BlockSpec((1, TR, OW), lambda c, r: (c, r, 0)),
        compiler_params=pltpu.CompilerParams(
            dimension_semantics=("parallel", "parallel"),
            vmem_limit_bytes=vmem2),
    )(scale_nc, shift_nc, ynchw)

    return out.reshape(N, Cout, OH, OW)


def _reference(x, encode_x, w_t, b, gamma, beta):
    """Pure-JAX f32 reference (lax.conv_general_dilated) for the correctness check."""
    xc = jnp.concatenate([x, encode_x], axis=1)
    w_oihw = jnp.transpose(w_t[:, :, ::-1, ::-1], (1, 0, 2, 3))
    y = lax.conv_general_dilated(
        xc, w_oihw, window_strides=(1, 1), padding=((1, 2), (1, 2)),
        lhs_dilation=(2, 2), rhs_dilation=(1, 1),
        dimension_numbers=('NCHW', 'OIHW', 'NCHW'))
    y = y + b[None, :, None, None]
    mean = jnp.mean(y, axis=(0, 2, 3), keepdims=True)
    var = jnp.mean((y - mean) ** 2, axis=(0, 2, 3), keepdims=True)
    y = (y - mean) * lax.rsqrt(var + EPS)
    y = y * gamma[None, :, None, None] + beta[None, :, None, None]
    return jnp.maximum(y, 0.0)


if __name__ == "__main__":
    key = jax.random.PRNGKey(0)
    k1, k2, k3, k4, k5, k6 = jax.random.split(key, 6)

    N, C1, C2, H, W = 2, 4, 4, 16, 16     # x channels, skip-connection channels
    in_channel = C1 + C2                  # 8 (channels seen by ConvTranspose2d)
    out_channel = 4

    x = jax.random.normal(k1, (N, C1, H, W), jnp.float32)
    encode_x = jax.random.normal(k2, (N, C2, H, W), jnp.float32)

    # ConvTranspose2d params (PyTorch-style uniform init, deterministic here).
    bound = (in_channel * K * K) ** -0.5
    w_t = jax.random.uniform(k3, (in_channel, out_channel, K, K),
                             jnp.float32, -bound, bound)
    b = jax.random.uniform(k4, (out_channel,), jnp.float32, -bound, bound)

    # Non-trivial BatchNorm2d affine params to exercise the fused scale/shift path.
    gamma = 1.0 + 0.1 * jax.random.normal(k5, (out_channel,), jnp.float32)
    beta = 0.1 * jax.random.normal(k6, (out_channel,), jnp.float32)

    fwd = jax.jit(decoder_block_forward)
    out = jax.block_until_ready(fwd(x, encode_x, w_t, b, gamma, beta))

    ref = _reference(x, encode_x, w_t, b, gamma, beta)
    assert out.shape == (N, out_channel, 2 * H, 2 * W), out.shape
    # Tolerance sized for bf16 MXU operands + bf16-stored conv output (f32 reference).
    max_err = float(jnp.max(jnp.abs(out - ref)))
    assert jnp.allclose(out, ref, atol=2.5e-2, rtol=2.5e-2), (
        f"mismatch vs JAX reference, max abs err {max_err}")

    print("KERNEL_OK")
</pallas_src>

<mosaic_0001>
module attributes {stable_mosaic.version = 11 : i64} {
  func.func @_conv_stats_kernel(%arg0: i32, %arg1: memref<4x16x4xbf16, #tpu.memory_space<vmem>>, %arg2: memref<4x16x4xbf16, #tpu.memory_space<vmem>>, %arg3: memref<1x4x256xf32, #tpu.memory_space<vmem>>, %arg4: memref<1x4x256xf32, #tpu.memory_space<vmem>>, %arg5: memref<1x16x256xbf16, #tpu.memory_space<vmem>>, %arg6: memref<1x16x2xf32, #tpu.memory_space<vmem>>) attributes {dimension_semantics = [#tpu.dimension_semantics<parallel>], iteration_bounds = array<i64: 2>, scalar_prefetch = 0 : i64, scratch_operands = 0 : i64, tpu.core_type = #tpu.core_type<tc>, window_params = [{pipeline_mode = #tpu.pipeline_mode<synchronous>, transform_indices = @transform_0, window_bounds = array<i64: 4, 16, 4>}, {pipeline_mode = #tpu.pipeline_mode<synchronous>, transform_indices = @transform_1, window_bounds = array<i64: 4, 16, 4>}, {transform_indices = @transform_2, window_bounds = array<i64: 1, 4, 256>}, {transform_indices = @transform_3, window_bounds = array<i64: 1, 4, 256>}, {transform_indices = @transform_4, window_bounds = array<i64: 1, 16, 256>}, {transform_indices = @transform_5, window_bounds = array<i64: 1, 16, 2>}]} {
    %0 = tpu.iota {dimensions = array<i32: 1>} : vector<1x256xi32>
    %c16_i32 = arith.constant 16 : i32
    %c0_i32 = arith.constant 0 : i32
    %1 = arith.cmpi eq, %c16_i32, %c0_i32 : i32
    %c1_i32 = arith.constant 1 : i32
    %2 = arith.select %1, %c1_i32, %c16_i32 : i32
    %3 = vector.broadcast %2 : i32 to vector<1x256xi32>
    %4 = arith.remsi %0, %3 : vector<1x256xi32>
    %c0_i32_0 = arith.constant 0 : i32
    %5 = vector.broadcast %c0_i32_0 : i32 to vector<1x256xi32>
    %6 = arith.cmpi ne, %4, %5 : vector<1x256xi32>
    %c0_i32_1 = arith.constant 0 : i32
    %7 = vector.broadcast %c0_i32_1 : i32 to vector<1x256xi32>
    %8 = arith.cmpi slt, %4, %7 : vector<1x256xi32>
    %c0_i32_2 = arith.constant 0 : i32
    %9 = arith.cmpi slt, %2, %c0_i32_2 : i32
    %10 = vector.broadcast %9 : i1 to vector<1x256xi1>
    %11 = vector.broadcast %10 : vector<1x256xi1> to vector<1x256xi1>
    %12 = arith.xori %8, %11 : vector<1x256xi1>
    %13 = arith.andi %12, %6 : vector<1x256xi1>
    %14 = vector.broadcast %2 : i32 to vector<1x256xi32>
    %15 = arith.addi %4, %14 : vector<1x256xi32>
    %16 = arith.select %13, %15, %4 : vector<1x256xi1>, vector<1x256xi32>
    %c15_i32 = arith.constant 15 : i32
    %17 = vector.broadcast %c15_i32 : i32 to vector<1x256xi32>
    %18 = arith.cmpi slt, %16, %17 : vector<1x256xi32>
    %c240_i32 = arith.constant 240 : i32
    %19 = vector.broadcast %c240_i32 : i32 to vector<1x256xi32>
    %20 = arith.cmpi slt, %0, %19 : vector<1x256xi32>
    %cst = arith.constant 0.000000e+00 : f32
    %21 = vector.broadcast %cst : f32 to vector<16x256xf32>
    %c0 = arith.constant 0 : index
    %c0_3 = arith.constant 0 : index
    %c0_4 = arith.constant 0 : index
    %22 = vector.load %arg3[%c0, %c0_3, %c0_4] : memref<1x4x256xf32, #tpu.memory_space<vmem>>, vector<1x4x256xf32>
    %23 = vector.shape_cast %22 : vector<1x4x256xf32> to vector<4x256xf32>
    %24 = arith.truncf %23 : vector<4x256xf32> to vector<4x256xbf16>
    %25 = vector.extract_strided_slice %24 {offsets = [0, 1], sizes = [4, 255], strides = [1, 1]} : vector<4x256xbf16> to vector<4x255xbf16>
    %cst_5 = arith.constant 0.000000e+00 : bf16
    %26 = vector.broadcast %cst_5 : bf16 to vector<4x1xbf16>
    %27 = tpu.concatenate %25, %26 in 1 : vector<4x255xbf16>, vector<4x1xbf16> -> vector<4x256xbf16>
    %cst_6 = arith.constant 0.000000e+00 : bf16
    %28 = vector.broadcast %cst_6 : bf16 to vector<4x256xbf16>
    %29 = vector.shape_cast %18 : vector<1x256xi1> to vector<1x256xi1>
    %30 = vector.broadcast %29 : vector<1x256xi1> to vector<4x256xi1>
    %31 = arith.select %30, %27, %28 : vector<4x256xi1>, vector<4x256xbf16>
    %32 = vector.extract_strided_slice %24 {offsets = [0, 16], sizes = [4, 240], strides = [1, 1]} : vector<4x256xbf16> to vector<4x240xbf16>
    %cst_7 = arith.constant 0.000000e+00 : bf16
    %33 = vector.broadcast %cst_7 : bf16 to vector<4x16xbf16>
    %34 = tpu.concatenate %32, %33 in 1 : vector<4x240xbf16>, vector<4x16xbf16> -> vector<4x256xbf16>
    %cst_8 = arith.constant 0.000000e+00 : bf16
    %35 = vector.broadcast %cst_8 : bf16 to vector<4x256xbf16>
    %36 = vector.shape_cast %20 : vector<1x256xi1> to vector<1x256xi1>
    %37 = vector.broadcast %36 : vector<1x256xi1> to vector<4x256xi1>
    %38 = arith.select %37, %34, %35 : vector<4x256xi1>, vector<4x256xbf16>
    %39 = arith.andi %18, %20 : vector<1x256xi1>
    %40 = vector.extract_strided_slice %24 {offsets = [0, 17], sizes = [4, 239], strides = [1, 1]} : vector<4x256xbf16> to vector<4x239xbf16>
    %cst_9 = arith.constant 0.000000e+00 : bf16
    %41 = vector.broadcast %cst_9 : bf16 to vector<4x17xbf16>
    %42 = tpu.concatenate %40, %41 in 1 : vector<4x239xbf16>, vector<4x17xbf16> -> vector<4x256xbf16>
    %cst_10 = arith.constant 0.000000e+00 : bf16
    %43 = vector.broadcast %cst_10 : bf16 to vector<4x256xbf16>
    %44 = vector.shape_cast %39 : vector<1x256xi1> to vector<1x256xi1>
    %45 = vector.broadcast %44 : vector<1x256xi1> to vector<4x256xi1>
    %46 = arith.select %45, %42, %43 : vector<4x256xi1>, vector<4x256xbf16>
    %c0_11 = arith.constant 0 : index
    %c0_12 = arith.constant 0 : index
    %c0_13 = arith.constant 0 : index
    %47 = vector.load %arg1[%c0_11, %c0_12, %c0_13] : memref<4x16x4xbf16, #tpu.memory_space<vmem>>, vector<1x16x4xbf16>
    %48 = vector.shape_cast %47 : vector<1x16x4xbf16> to vector<16x4xbf16>
    %cst_14 = arith.constant dense<0.000000e+00> : vector<16x256xf32>
    %49 = tpu.matmul %48, %24, %cst_14 {dimension_numbers = #tpu.dot_dimension_numbers<[1], [0], [0], [1], [0, 0, 1, 1], [], []>} : vector<16x4xbf16>, vector<4x256xbf16>, vector<16x256xf32> -> vector<16x256xf32>
    %50 = arith.addf %21, %49 : vector<16x256xf32>
    %c1 = arith.constant 1 : index
    %c0_15 = arith.constant 0 : index
    %c0_16 = arith.constant 0 : index
    %51 = vector.load %arg1[%c1, %c0_15, %c0_16] : memref<4x16x4xbf16, #tpu.memory_space<vmem>>, vector<1x16x4xbf16>
    %52 = vector.shape_cast %51 : vector<1x16x4xbf16> to vector<16x4xbf16>
    %cst_17 = arith.constant dense<0.000000e+00> : vector<16x256xf32>
    %53 = tpu.matmul %52, %31, %cst_17 {dimension_numbers = #tpu.dot_dimension_numbers<[1], [0], [0], [1], [0, 0, 1, 1], [], []>} : vector<16x4xbf16>, vector<4x256xbf16>, vector<16x256xf32> -> vector<16x256xf32>
    %54 = arith.addf %50, %53 : vector<16x256xf32>
    %c2 = arith.constant 2 : index
    %c0_18 = arith.constant 0 : index
    %c0_19 = arith.constant 0 : index
    %55 = vector.load %arg1[%c2, %c0_18, %c0_19] : memref<4x16x4xbf16, #tpu.memory_space<vmem>>, vector<1x16x4xbf16>
    %56 = vector.shape_cast %55 : vector<1x16x4xbf16> to vector<16x4xbf16>
    %cst_20 = arith.constant dense<0.000000e+00> : vector<16x256xf32>
    %57 = tpu.matmul %56, %38, %cst_20 {dimension_numbers = #tpu.dot_dimension_numbers<[1], [0], [0], [1], [0, 0, 1, 1], [], []>} : vector<16x4xbf16>, vector<4x256xbf16>, vector<16x256xf32> -> vector<16x256xf32>
    %58 = arith.addf %54, %57 : vector<16x256xf32>
    %c3 = arith.constant 3 : index
    %c0_21 = arith.constant 0 : index
    %c0_22 = arith.constant 0 : index
    %59 = vector.load %arg1[%c3, %c0_21, %c0_22] : memref<4x16x4xbf16, #tpu.memory_space<vmem>>, vector<1x16x4xbf16>
    %60 = vector.shape_cast %59 : vector<1x16x4xbf16> to vector<16x4xbf16>
    %cst_23 = arith.constant dense<0.000000e+00> : vector<16x256xf32>
    %61 = tpu.matmul %60, %46, %cst_23 {dimension_numbers = #tpu.dot_dimension_numbers<[1], [0], [0], [1], [0, 0, 1, 1], [], []>} : vector<16x4xbf16>, vector<4x256xbf16>, vector<16x256xf32> -> vector<16x256xf32>
    %62 = arith.addf %58, %61 : vector<16x256xf32>
    %c0_24 = arith.constant 0 : index
    %c0_25 = arith.constant 0 : index
    %c0_26 = arith.constant 0 : index
    %63 = vector.load %arg4[%c0_24, %c0_25, %c0_26] : memref<1x4x256xf32, #tpu.memory_space<vmem>>, vector<1x4x256xf32>
    %64 = vector.shape_cast %63 : vector<1x4x256xf32> to vector<4x256xf32>
    %65 = arith.truncf %64 : vector<4x256xf32> to vector<4x256xbf16>
    %66 = vector.extract_strided_slice %65 {offsets = [0, 1], sizes = [4, 255], strides = [1, 1]} : vector<4x256xbf16> to vector<4x255xbf16>
    %cst_27 = arith.constant 0.000000e+00 : bf16
    %67 = vector.broadcast %cst_27 : bf16 to vector<4x1xbf16>
    %68 = tpu.concatenate %66, %67 in 1 : vector<4x255xbf16>, vector<4x1xbf16> -> vector<4x256xbf16>
    %cst_28 = arith.constant 0.000000e+00 : bf16
    %69 = vector.broadcast %cst_28 : bf16 to vector<4x256xbf16>
    %70 = vector.shape_cast %18 : vector<1x256xi1> to vector<1x256xi1>
    %71 = vector.broadcast %70 : vector<1x256xi1> to vector<4x256xi1>
    %72 = arith.select %71, %68, %69 : vector<4x256xi1>, vector<4x256xbf16>
    %73 = vector.extract_strided_slice %65 {offsets = [0, 16], sizes = [4, 240], strides = [1, 1]} : vector<4x256xbf16> to vector<4x240xbf16>
    %cst_29 = arith.constant 0.000000e+00 : bf16
    %74 = vector.broadcast %cst_29 : bf16 to vector<4x16xbf16>
    %75 = tpu.concatenate %73, %74 in 1 : vector<4x240xbf16>, vector<4x16xbf16> -> vector<4x256xbf16>
    %cst_30 = arith.constant 0.000000e+00 : bf16
    %76 = vector.broadcast %cst_30 : bf16 to vector<4x256xbf16>
    %77 = vector.shape_cast %20 : vector<1x256xi1> to vector<1x256xi1>
    %78 = vector.broadcast %77 : vector<1x256xi1> to vector<4x256xi1>
    %79 = arith.select %78, %75, %76 : vector<4x256xi1>, vector<4x256xbf16>
    %80 = arith.andi %18, %20 : vector<1x256xi1>
    %81 = vector.extract_strided_slice %65 {offsets = [0, 17], sizes = [4, 239], strides = [1, 1]} : vector<4x256xbf16> to vector<4x239xbf16>
    %cst_31 = arith.constant 0.000000e+00 : bf16
    %82 = vector.broadcast %cst_31 : bf16 to vector<4x17xbf16>
    %83 = tpu.concatenate %81, %82 in 1 : vector<4x239xbf16>, vector<4x17xbf16> -> vector<4x256xbf16>
    %cst_32 = arith.constant 0.000000e+00 : bf16
    %84 = vector.broadcast %cst_32 : bf16 to vector<4x256xbf16>
    %85 = vector.shape_cast %80 : vector<1x256xi1> to vector<1x256xi1>
    %86 = vector.broadcast %85 : vector<1x256xi1> to vector<4x256xi1>
    %87 = arith.select %86, %83, %84 : vector<4x256xi1>, vector<4x256xbf16>
    %c0_33 = arith.constant 0 : index
    %c0_34 = arith.constant 0 : index
    %c0_35 = arith.constant 0 : index
    %88 = vector.load %arg2[%c0_33, %c0_34, %c0_35] : memref<4x16x4xbf16, #tpu.memory_space<vmem>>, vector<1x16x4xbf16>
    %89 = vector.shape_cast %88 : vector<1x16x4xbf16> to vector<16x4xbf16>
    %cst_36 = arith.constant dense<0.000000e+00> : vector<16x256xf32>
    %90 = tpu.matmul %89, %65, %cst_36 {dimension_numbers = #tpu.dot_dimension_numbers<[1], [0], [0], [1], [0, 0, 1, 1], [], []>} : vector<16x4xbf16>, vector<4x256xbf16>, vector<16x256xf32> -> vector<16x256xf32>
    %91 = arith.addf %62, %90 : vector<16x256xf32>
    %c1_37 = arith.constant 1 : index
    %c0_38 = arith.constant 0 : index
    %c0_39 = arith.constant 0 : index
    %92 = vector.load %arg2[%c1_37, %c0_38, %c0_39] : memref<4x16x4xbf16, #tpu.memory_space<vmem>>, vector<1x16x4xbf16>
    %93 = vector.shape_cast %92 : vector<1x16x4xbf16> to vector<16x4xbf16>
    %cst_40 = arith.constant dense<0.000000e+00> : vector<16x256xf32>
    %94 = tpu.matmul %93, %72, %cst_40 {dimension_numbers = #tpu.dot_dimension_numbers<[1], [0], [0], [1], [0, 0, 1, 1], [], []>} : vector<16x4xbf16>, vector<4x256xbf16>, vector<16x256xf32> -> vector<16x256xf32>
    %95 = arith.addf %91, %94 : vector<16x256xf32>
    %c2_41 = arith.constant 2 : index
    %c0_42 = arith.constant 0 : index
    %c0_43 = arith.constant 0 : index
    %96 = vector.load %arg2[%c2_41, %c0_42, %c0_43] : memref<4x16x4xbf16, #tpu.memory_space<vmem>>, vector<1x16x4xbf16>
    %97 = vector.shape_cast %96 : vector<1x16x4xbf16> to vector<16x4xbf16>
    %cst_44 = arith.constant dense<0.000000e+00> : vector<16x256xf32>
    %98 = tpu.matmul %97, %79, %cst_44 {dimension_numbers = #tpu.dot_dimension_numbers<[1], [0], [0], [1], [0, 0, 1, 1], [], []>} : vector<16x4xbf16>, vector<4x256xbf16>, vector<16x256xf32> -> vector<16x256xf32>
    %99 = arith.addf %95, %98 : vector<16x256xf32>
    %c3_45 = arith.constant 3 : index
    %c0_46 = arith.constant 0 : index
    %c0_47 = arith.constant 0 : index
    %100 = vector.load %arg2[%c3_45, %c0_46, %c0_47] : memref<4x16x4xbf16, #tpu.memory_space<vmem>>, vector<1x16x4xbf16>
    %101 = vector.shape_cast %100 : vector<1x16x4xbf16> to vector<16x4xbf16>
    %cst_48 = arith.constant dense<0.000000e+00> : vector<16x256xf32>
    %102 = tpu.matmul %101, %87, %cst_48 {dimension_numbers = #tpu.dot_dimension_numbers<[1], [0], [0], [1], [0, 0, 1, 1], [], []>} : vector<16x4xbf16>, vector<4x256xbf16>, vector<16x256xf32> -> vector<16x256xf32>
    %103 = arith.addf %99, %102 : vector<16x256xf32>
    %104 = arith.truncf %103 : vector<16x256xf32> to vector<16x256xbf16>
    %c0_49 = arith.constant 0 : index
    %c0_50 = arith.constant 0 : index
    %c0_51 = arith.constant 0 : index
    %105 = vector.load %arg5[%c0_49, %c0_50, %c0_51] : memref<1x16x256xbf16, #tpu.memory_space<vmem>>, vector<1x16x256xbf16>
    %106 = vector.shape_cast %105 : vector<1x16x256xbf16> to vector<16x256xbf16>
    %107 = vector.shape_cast %104 : vector<16x256xbf16> to vector<1x16x256xbf16>
    tpu.vector_store %arg5[%c0_49, %c0_50, %c0_51], %107 {strides = array<i32>} : memref<1x16x256xbf16, #tpu.memory_space<vmem>>, vector<1x16x256xbf16>,
    %cst_52 = arith.constant dense<0.000000e+00> : vector<16xf32>
    %108 = vector.multi_reduction <add>, %103, %cst_52 [1] : vector<16x256xf32> to vector<16xf32>
    %109 = vector.shape_cast %108 : vector<16xf32> to vector<16x1xf32>
    %c0_53 = arith.constant 0 : index
    %c0_54 = arith.constant 0 : index
    %c0_55 = arith.constant 0 : index
    %110 = vector.load %arg6[%c0_53, %c0_54, %c0_55] : memref<1x16x2xf32, #tpu.memory_space<vmem>>, vector<1x16x1xf32>
    %111 = vector.shape_cast %110 : vector<1x16x1xf32> to vector<16x1xf32>
    %112 = vector.shape_cast %109 : vector<16x1xf32> to vector<1x16x1xf32>
    tpu.vector_store %arg6[%c0_53, %c0_54, %c0_55], %112 {strides = array<i32>} : memref<1x16x2xf32, #tpu.memory_space<vmem>>, vector<1x16x1xf32>,
    %113 = arith.mulf %103, %103 : vector<16x256xf32>
    %cst_56 = arith.constant dense<0.000000e+00> : vector<16xf32>
    %114 = vector.multi_reduction <add>, %113, %cst_56 [1] : vector<16x256xf32> to vector<16xf32>
    %115 = vector.shape_cast %114 : vector<16xf32> to vector<16x1xf32>
    %c0_57 = arith.constant 0 : index
    %c0_58 = arith.constant 0 : index
    %c1_59 = arith.constant 1 : index
    %116 = vector.load %arg6[%c0_57, %c0_58, %c1_59] : memref<1x16x2xf32, #tpu.memory_space<vmem>>, vector<1x16x1xf32>
    %117 = vector.shape_cast %116 : vector<1x16x1xf32> to vector<16x1xf32>
    %118 = vector.shape_cast %115 : vector<16x1xf32> to vector<1x16x1xf32>
    tpu.vector_store %arg6[%c0_57, %c0_58, %c1_59], %118 {strides = array<i32>} : memref<1x16x2xf32, #tpu.memory_space<vmem>>, vector<1x16x1xf32>,
    return
  }
  func.func @transform_0(%arg0: i32) -> (i32, i32, i32) {
    %c0_i32 = arith.constant 0 : i32
    %c0_i32_0 = arith.constant 0 : i32
    %c0_i32_1 = arith.constant 0 : i32
    %c0_i32_2 = arith.constant 0 : i32
    return %c0_i32, %c0_i32_0, %c0_i32_1 : i32, i32, i32
  }
  func.func @transform_1(%arg0: i32) -> (i32, i32, i32) {
    %c0_i32 = arith.constant 0 : i32
    %c0_i32_0 = arith.constant 0 : i32
    %c0_i32_1 = arith.constant 0 : i32
    %c0_i32_2 = arith.constant 0 : i32
    return %c0_i32, %c0_i32_0, %c0_i32_1 : i32, i32, i32
  }
  func.func @transform_2(%arg0: i32) -> (i32, i32, i32) {
    %c0_i32 = arith.constant 0 : i32
    %c0_i32_0 = arith.constant 0 : i32
    %c0_i32_1 = arith.constant 0 : i32
    return %arg0, %c0_i32, %c0_i32_0 : i32, i32, i32
  }
  func.func @transform_3(%arg0: i32) -> (i32, i32, i32) {
    %c0_i32 = arith.constant 0 : i32
    %c0_i32_0 = arith.constant 0 : i32
    %c0_i32_1 = arith.constant 0 : i32
    return %arg0, %c0_i32, %c0_i32_0 : i32, i32, i32
  }
  func.func @transform_4(%arg0: i32) -> (i32, i32, i32) {
    %c0_i32 = arith.constant 0 : i32
    %c0_i32_0 = arith.constant 0 : i32
    %c0_i32_1 = arith.constant 0 : i32
    return %arg0, %c0_i32, %c0_i32_0 : i32, i32, i32
  }
  func.func @transform_5(%arg0: i32) -> (i32, i32, i32) {
    %c0_i32 = arith.constant 0 : i32
    %c0_i32_0 = arith.constant 0 : i32
    %c0_i32_1 = arith.constant 0 : i32
    return %arg0, %c0_i32, %c0_i32_0 : i32, i32, i32
  }
}

module attributes {stable_mosaic.version = 11 : i64} {
  func.func @_bn_relu_kernel(%arg0: i32, %arg1: i32, %arg2: memref<1x1x1xf32, #tpu.memory_space<vmem>>, %arg3: memref<1x1x1xf32, #tpu.memory_space<vmem>>, %arg4: memref<1x32x32xbf16, #tpu.memory_space<vmem>>, %arg5: memref<1x32x32xf32, #tpu.memory_space<vmem>>) attributes {dimension_semantics = [#tpu.dimension_semantics<parallel>, #tpu.dimension_semantics<parallel>], iteration_bounds = array<i64: 8, 1>, scalar_prefetch = 0 : i64, scratch_operands = 0 : i64, tpu.core_type = #tpu.core_type<tc>, window_params = [{transform_indices = @transform_0, window_bounds = array<i64: 1, 1, 1>}, {transform_indices = @transform_1, window_bounds = array<i64: 1, 1, 1>}, {transform_indices = @transform_2, window_bounds = array<i64: 1, 32, 32>}, {transform_indices = @transform_3, window_bounds = array<i64: 1, 32, 32>}]} {
    %c0 = arith.constant 0 : index
    %c0_0 = arith.constant 0 : index
    %c0_1 = arith.constant 0 : index
    %0 = vector.load %arg4[%c0, %c0_0, %c0_1] : memref<1x32x32xbf16, #tpu.memory_space<vmem>>, vector<1x32x32xbf16>
    %1 = arith.extf %0 : vector<1x32x32xbf16> to vector<1x32x32xf32>
    %c0_2 = arith.constant 0 : index
    %c0_3 = arith.constant 0 : index
    %c0_4 = arith.constant 0 : index
    %2 = vector.load %arg2[%c0_2, %c0_3, %c0_4] : memref<1x1x1xf32, #tpu.memory_space<vmem>>, vector<1x1x1xf32>
    %3 = vector.broadcast %2 : vector<1x1x1xf32> to vector<1x32x32xf32>
    %4 = arith.mulf %1, %3 : vector<1x32x32xf32>
    %c0_5 = arith.constant 0 : index
    %c0_6 = arith.constant 0 : index
    %c0_7 = arith.constant 0 : index
    %5 = vector.load %arg3[%c0_5, %c0_6, %c0_7] : memref<1x1x1xf32, #tpu.memory_space<vmem>>, vector<1x1x1xf32>
    %6 = vector.broadcast %5 : vector<1x1x1xf32> to vector<1x32x32xf32>
    %7 = arith.addf %4, %6 : vector<1x32x32xf32>
    %cst = arith.constant 0.000000e+00 : f32
    %8 = vector.broadcast %cst : f32 to vector<1x32x32xf32>
    %9 = arith.maximumf %7, %8 : vector<1x32x32xf32>
    %c0_8 = arith.constant 0 : index
    %c0_9 = arith.constant 0 : index
    %c0_10 = arith.constant 0 : index
    %10 = vector.load %arg5[%c0_8, %c0_9, %c0_10] : memref<1x32x32xf32, #tpu.memory_space<vmem>>, vector<1x32x32xf32>
    tpu.vector_store %arg5[%c0_8, %c0_9, %c0_10], %9 {strides = array<i32>} : memref<1x32x32xf32, #tpu.memory_space<vmem>>, vector<1x32x32xf32>,
    return
  }
  func.func @transform_0(%arg0: i32, %arg1: i32) -> (i32, i32, i32) {
    %c0_i32 = arith.constant 0 : i32
    %c0_i32_0 = arith.constant 0 : i32
    %c0_i32_1 = arith.constant 0 : i32
    return %arg0, %c0_i32, %c0_i32_0 : i32, i32, i32
  }
  func.func @transform_1(%arg0: i32, %arg1: i32) -> (i32, i32, i32) {
    %c0_i32 = arith.constant 0 : i32
    %c0_i32_0 = arith.constant 0 : i32
    %c0_i32_1 = arith.constant 0 : i32
    return %arg0, %c0_i32, %c0_i32_0 : i32, i32, i32
  }
  func.func @transform_2(%arg0: i32, %arg1: i32) -> (i32, i32, i32) {
    %c0_i32 = arith.constant 0 : i32
    %c0_i32_0 = arith.constant 0 : i32
    return %arg0, %arg1, %c0_i32 : i32, i32, i32
  }
  func.func @transform_3(%arg0: i32, %arg1: i32) -> (i32, i32, i32) {
    %c0_i32 = arith.constant 0 : i32
    %c0_i32_0 = arith.constant 0 : i32
    return %arg0, %arg1, %c0_i32 : i32, i32, i32
  }
}

</mosaic_0001>

<bundles_post_ra>
// kernel: tile.18
= control target key start
LH: loop header
LB: loop body
LE: loop exit
PB: predicated region body
PF: predicated region fallthrough
CT: control target
= control target key end

     0   :  { %s22_s0 = inlined_call_operand.vmem [shape: f32[4], index: 0, kind: input, shape index: {}]   ;;  %s23_s1 = inlined_call_operand.vmem [shape: f32[2,4], index: 1, kind: output, shape index: {}]  }
   0x1   :  { %v4_v0 = vld [vmem:[%s22_s0] ss:$0 sm:$0xff] }
   0x2   :  { %5 = vst [vmem:[%s23_s1] sm:$0x3] %v4_v0 }

// kernel: tile.0
= control target key start
LH: loop header
LB: loop body
LE: loop exit
PB: predicated region body
PF: predicated region fallthrough
CT: control target
= control target key end

     0   :  { %vm7_vm0 = vcmask 7168   ;;  %s99_s8 = smov 125   ;;  %s100_s9 = smov 126   ;;  %s146_s0 = inlined_call_operand.vmem [shape: f32[2,4], index: 0, kind: input, shape index: {}]   ;;  %s147_s1 = inlined_call_operand.vmem [shape: f32[8,1,1], index: 1, kind: output, shape index: {}]  }
   0x1   :  { %v4_v0 = vld [vmem:[%s146_s0] sm:$0x3]  ;;  %s98_s0 = smov 127  }
   0x2   :  { %5 = vst [vmem:[#allocation1] sm:$0x3] %v4_v0 }
   0x9   :  { %v11_v1 = vld [vmem:[#allocation1] sm:$0x3]  }
   0xa   :  { %v6_v2 = vld [vmem:[#allocation1] sm:$0x3]   ;;  %12 = vrot.lane.b32.xlu0 %v11_v1, %s98_s0 }
   0xb   :  { %v27_v3 = vld [vmem:[#allocation1] sm:$0x3]   ;;  %8 = vst.msk [vmem:[#allocation0] sm:$0x1] %vm7_vm0, %v6_v2   ;;  %10 = vst.msk [vmem:[#allocation0 + $0x1f] sm:$0x2] %vm7_vm0, %v6_v2  }
   0xc   :  { %28 = vrot.lane.b32.xlu1 %v27_v3, %s99_s8  ;;  %v19_v4 = vld [vmem:[#allocation1] sm:$0x3]  }
   0xe   :  { %20 = vrot.lane.b32.xlu0 %v19_v4, %s100_s9 }
  0x12   :  { %v38_v5 = vld [vmem:[#allocation0] sm:$0x1] }
  0x13   :  { %v59_v6 = vld [vmem:[#allocation0 + $0x20] sm:$0x1]  ;;  %40 = vst [vmem:[%s147_s1] sm:$0x1] %v38_v5 }
  0x14   :  { %91 = vst [vmem:[%s147_s1 + $0x4] sm:$0x1] %v59_v6 }
  0x7c   :  { %v13_v7 = vpop.permute.xlu0 %12  }
  0x7d   :  { %16 = vst.msk [vmem:[#allocation0 + $0x8] sm:$0x1] %vm7_vm0, %v13_v7   ;;  %18 = vst.msk [vmem:[#allocation0 + $0x27] sm:$0x2] %vm7_vm0, %v13_v7  }
  0x7e   :  { %v29_v8 = vpop.permute.xlu1 %28  }
  0x7f   :  { %32 = vst.msk [vmem:[#allocation0 + $0x18] sm:$0x1] %vm7_vm0, %v29_v8   ;;  %34 = vst.msk [vmem:[#allocation0 + $0x37] sm:$0x2] %vm7_vm0, %v29_v8  }
  0x80   :  { %v21_v9 = vpop.permute.xlu0 %20  }
  0x81   :  { %24 = vst.msk [vmem:[#allocation0 + $0x10] sm:$0x1] %vm7_vm0, %v21_v9   ;;  %26 = vst.msk [vmem:[#allocation0 + $0x2f] sm:$0x2] %vm7_vm0, %v21_v9  }
  0x84   :  { %v42_v10 = vld [vmem:[#allocation0 + $0x8] sm:$0x1] }
  0x85   :  { %v65_v11 = vld [vmem:[#allocation0 + $0x28] sm:$0x1]  ;;  %88 = vst [vmem:[%s147_s1 + $0x1] sm:$0x1] %v42_v10 }
  0x86   :  { %v53_v12 = vld [vmem:[#allocation0 + $0x18] sm:$0x1]  ;;  %92 = vst [vmem:[%s147_s1 + $0x5] sm:$0x1] %v65_v11 }
  0x87   :  { %90 = vst [vmem:[%s147_s1 + $0x3] sm:$0x1] %v53_v12  ;;  %v77_v13 = vld [vmem:[#allocation0 + $0x38] sm:$0x1] }
  0x88   :  { %94 = vst [vmem:[%s147_s1 + $0x7] sm:$0x1] %v77_v13  ;;  %v47_v14 = vld [vmem:[#allocation0 + $0x10] sm:$0x1] }
  0x89   :  { %v71_v15 = vld [vmem:[#allocation0 + $0x30] sm:$0x1]  ;;  %89 = vst [vmem:[%s147_s1 + $0x2] sm:$0x1] %v47_v14 }
  0x8a   :  { %93 = vst [vmem:[%s147_s1 + $0x6] sm:$0x1] %v71_v15 }

// kernel: decoder_block_forward.2
= control target key start
LH: loop header
LB: loop body
LE: loop exit
PB: predicated region body
PF: predicated region fallthrough
CT: control target
= control target key end

     0   :  { %s1224_s18 = smov 0   ;;  %s1412_s0 = inlined_call_operand.vmem [shape: bf16[4,16,4], index: 0, kind: input, shape index: {}]   ;;  %s1413_s1 = inlined_call_operand.vmem [shape: bf16[4,16,4], index: 1, kind: input, shape index: {}]   ;;  %s1414_s2 = inlined_call_operand.vmem [shape: f32[2,4,256], index: 2, kind: input, shape index: {}]   ;;  %s1415_s3 = inlined_call_operand.vmem [shape: f32[2,4,256], index: 3, kind: input, shape index: {}]   ;;  %s1416_s4 = inlined_call_operand.vmem [shape: bf16[2,16,256], index: 4, kind: output, shape index: {0}]   ;;  %s1417_s5 = inlined_call_operand.vmem [shape: f32[2,16,2], index: 5, kind: output, shape index: {1}]  }
   0x1 LB: > { %s1071_s19 = sadd.s32 4294967295, %s1187_s18   ;;  %p1075_p0 = scmp.ge.s32.totalorder %s1187_s18, 1  ;;  %s1187_s18 = sphi %s1224_s18, %s16_s18  }
   0x2   : > { %p200_p1 = scmp.lt.s32.totalorder %s1187_s18, 3 }
   0x4   : > { %p201_p2 = pnand %p1075_p0, %p200_p1 }
   0x5   : > { %p238_p3 = scmp.lt.s32.totalorder (!%p201_p2), %s1071_s19, 1  ;;  %v1189_v0 = vmov (!%p201_p2), 0   ;;  %vm404_vm0 = vcmask (!%p201_p2), 1041408   ;;  %s1190_s27 = smov (!%p201_p2), 127   ;;  %v1173_v10 = vld [vmem:[%s1413_s1] sm:$0xff] (!%p201_p2)   ;;  %vm400_vm1 = vcmask (!%p201_p2), 31744   ;;  %v261_v11 = vlaneseq (!%p201_p2) }
   0x6   : > { %204 = sbr.rel (%p201_p2) target bundleno = 549 (0x225), region = 36  ;;  %728 = vmatprep.mubr.bf16.mxu0 (!%p201_p2), %v1189_v0  ;;  %443 = vmatprep.mubr.bf16.mxu1 (!%p201_p2), %v1189_v0  ;;  %s1191_s30 = smov (!%p201_p2), 112   ;;  %vm1193_vm6 = vmmov (!%p201_p2), 1   ;;  %vm304_vm8 = vcmask (!%p201_p2), 1039360   ;;  %v1174_v43 = vld [vmem:[%s1412_s0 + $0x8] sm:$0xff] (!%p201_p2)   ;;  %vm334_vm12 = vcmask (!%p201_p2), 916480  }
   0x7   : > { %s1192_s6 = smov (!%p201_p2), 111   ;;  %v262_v12 = vand.u32 (!%p201_p2), 127, %v261_v11  ;;  %v319_v18 = vshrl.u32 (!%p201_p2), %v261_v11, 7  ;;  %v1175_v44 = vld [vmem:[%s1413_s1 + $0x8] sm:$0xff] (!%p201_p2)  }
   0x9   : > { %v263_v13 = vadd.s32 (!%p201_p2), 128, %v262_v12  ;;  %v268_v14 = vand.u32 (!%p201_p2), 15, %v262_v12  ;;  %v1272_v19 = vsub.s32 (!%p201_p2), 4, %v319_v18  ;;  %v1274_v20 = vsub.s32 (!%p201_p2), 0, %v319_v18 }
   0xb   : > { %v275_v15 = vand.u32 (!%p201_p2), 15, %v263_v13  ;;  %vm1260_vm2 = vcmp.lt.s32.totalorder (!%p201_p2), %v268_v14, 15  ;;  %vm291_vm5 = vcmp.lt.s32.totalorder (!%p201_p2), %v263_v13, 240 }
   0xc   : > { %vm345_vm7 = vmpackc.low (!%p201_p2), %vm291_vm5, %vm1193_vm6 }
   0xd   : > { %s1437_s19 = smov (!%p238_p3, %s1071_s19), 1  ;;  %vm1264_vm3 = vcmp.lt.s32.totalorder %v275_v15, 15  ;;  %v346_v26 = vsel %vm345_vm7, 65537, %v1189_v0 }
   0xe   : > { %s1124_s20 = sshll.u32 %s1437_s19, 3  ;;  %vm316_vm4 = vmpackc.low %vm1264_vm3, %vm1260_vm2  ;;  %v354_v31 = vrot.slane %v346_v26, %v1272_v19  ;;  %v350_v45 = vrot.slane %v346_v26, %v1274_v20 }
   0xf   : > { %s247_s23 = scalar_lea.vmem %s1415_s3, %s1124_s20  ;;  %s242_s26 = scalar_lea.vmem %s1414_s2, %s1124_s20  ;;  %v317_v21 = vsel %vm316_vm4, 65537, %v1189_v0  ;;  %vm1295_vm11 = vmand %vm1264_vm3, %vm291_vm5 }
  0x10   : > { %v639_v1 = vld [vmem:[%s247_s23] sm:$0xff]  ;;  %v325_v22 = vrot.slane %v317_v21, %v1272_v19  ;;  %v321_v23 = vrot.slane %v317_v21, %v1274_v20  ;;  %vm376_vm13 = vmpackc.low %vm1295_vm11, %vm1260_vm2  ;;  %vm1322_vm14 = vcmp.ne.s16.totalorder %v354_v31, 0  ;;  %vm1333_vm15 = vcmp.ne.s16.totalorder %v350_v45, 0  ;;  %v1179_v21 = vld [vmem:[%s1413_s1 + $0x18] sm:$0xff]   ;;  %s1126_s23 = sshll.u32 %s1437_s19, 4 }
  0x11   : > { %v292_v2 = vld [vmem:[%s242_s26] sm:$0xff]  ;;  %v643_v3 = vpack.c.bf16 %v639_v1, %v639_v1  ;;  %v641_v5 = vcombine.high %v639_v1, %v639_v1  ;;  %v377_v55 = vsel %vm376_vm13, 65537, %v1189_v0  ;;  %vm365_vm2 = vcmask 908288   ;;  %s252_s26 = scalar_lea.vmem %s1416_s4, %s1126_s23  ;;  %s257_s28 = scalar_lea.vmem %s1417_s5, %s1126_s23 }
  0x12   : > { %v1243_v4 = vpack.c.bf16 %v292_v2, %v292_v2  ;;  %v294_v6 = vcombine.high %v292_v2, %v292_v2  ;;  %vm1281_vm9 = vcmp.ne.s16.totalorder %v325_v22, 0  ;;  %vm1285_vm10 = vcmp.ne.s16.totalorder %v321_v23, 0  ;;  %v1180_v23 = vld [vmem:[%s1412_s0 + $0x18] sm:$0xff]  }
  0x13   : > { %647 = vrot.lane.b32.xlu1 %v643_v3, %s1190_s27  ;;  %v644_v7 = vpack.c.bf16 %v641_v5, %v641_v5  ;;  %v691_v9 = vsel %vm404_vm0, %v643_v3, 0  ;;  %v385_v62 = vrot.slane %v377_v55, %v1272_v19  ;;  %v381_v63 = vrot.slane %v377_v55, %v1274_v20  ;;  %v1177_v5 = vld [vmem:[%s1413_s1 + $0x10] sm:$0xff]  }
  0x14   : > { %300 = vrot.lane.b32.xlu0 %v1243_v4, %s1190_s27  ;;  %v1246_v8 = vpack.c.bf16 %v294_v6, %v294_v6  ;;  %v463_v50 = vsel %vm404_vm0, %v1243_v4, 0  ;;  %v1178_v20 = vld [vmem:[%s1412_s0 + $0x10] sm:$0xff]  }
  0x15   : > { %1103 = vmatprep.subr.msk.bf16.mxu0 %vm404_vm0, %v644_v7  ;;  %vm1360_vm3 = vcmp.ne.s16.totalorder %v385_v62, 0  ;;  %vm1365_vm4 = vcmp.ne.s16.totalorder %v381_v63, 0 }
  0x16   : > { %697 = vmatpush1.bf16.msra.mxu0 %v691_v9 }
  0x17   : > { %649 = vrot.lane.b32.xlu1 %v644_v7, %s1190_s27 }
  0x18   : > { %302 = vrot.lane.b32.xlu0 %v1246_v8, %s1190_s27 }
  0x19   : > { %1104 = vmatmul.mubr.msk.bf16.vlgmr.msra.gmra.mrb[0].mxu0 %vm400_vm1, %v1173_v10 }
  0x1a   : > { %792 = vmatprep.mubr.bf16.mxu0 %v1189_v0 }
  0x1b   : > { %332 = vrot.lane.b32.xlu1 %v1246_v8, %s1191_s30 }
  0x1c   : > { %330 = vrot.lane.b32.xlu0 %v1243_v4, %s1191_s30 }
  0x1f   : > { %660 = vrot.lane.b32.xlu1 %v644_v7, %s1191_s30 }
  0x20   : > { %658 = vrot.lane.b32.xlu0 %v643_v3, %s1191_s30 }
  0x23   : > { %363 = vrot.lane.b32.xlu1 %v1246_v8, %s1192_s6 }
  0x24   : > { %361 = vrot.lane.b32.xlu0 %v1243_v4, %s1192_s6  ;;  %v1176_v4 = vld [vmem:[%s1412_s0] sm:$0xff]  }
  0x27   : > { %671 = vrot.lane.b32.xlu1 %v644_v7, %s1192_s6 }
  0x28   : > { %669 = vrot.lane.b32.xlu0 %v643_v3, %s1192_s6 }
  0x85   : > { %v648_v24 = vpop.permute.xlu1 %647 }
  0x86   : > { %v301_v25 = vpop.permute.xlu0 %300 }
  0x89   : > { %v650_v29 = vpop.permute.xlu1 %649 }
  0x8a   : > { %v303_v30 = vpop.permute.xlu0 %302  ;;  %v651_v32 = vsel %vm304_vm8, %v648_v24, %v650_v29  ;;  %v654_v33 = vsel %vm304_vm8, %v650_v29, 0 }
  0x8b   : > { %v305_v34 = vsel %vm304_vm8, %v301_v25, %v303_v30  ;;  %v310_v35 = vsel %vm304_vm8, %v303_v30, 0  ;;  %v657_v38 = vsel %vm1281_vm9, %v654_v33, 0  ;;  %v656_v40 = vsel %vm1285_vm10, %v651_v32, 0 }
  0x8c   : > { %v329_v36 = vsel %vm1281_vm9, %v310_v35, 0  ;;  %v328_v39 = vsel %vm1285_vm10, %v305_v34, 0  ;;  %1108 = vmatprep.subr.msk.bf16.mxu0 %vm404_vm0, %v657_v38  ;;  %v755_v42 = vsel %vm404_vm0, %v656_v40, 0 }
  0x8d   : > { %1087 = vmatprep.subr.msk.bf16.mxu1 %vm404_vm0, %v329_v36  ;;  %v406_v41 = vsel %vm404_vm0, %v328_v39, 0  ;;  %761 = vmatpush1.bf16.msra.mxu0 %v755_v42  ;;  %v333_v46 = vpop.permute.xlu1 %332 }
  0x8e   : > { %412 = vmatpush1.bf16.msra.mxu1 %v406_v41  ;;  %v331_v47 = vpop.permute.xlu0 %330  ;;  %v339_v49 = vsel %vm334_vm12, %v333_v46, 0 }
  0x8f   : > { %1090 = vmatprep.subr.msk.bf16.mxu1 %vm404_vm0, %v1246_v8  ;;  %v358_v51 = vsel %vm1322_vm14, %v339_v49, 0  ;;  %v335_v60 = vsel %vm334_vm12, %v331_v47, %v333_v46 }
  0x90   : > { %1109 = vmatmul.mubr.msk.bf16.vlgmr.msra.gmra.mrb[0].mxu0 %vm400_vm1, %v1175_v44  ;;  %v357_v3 = vsel %vm1333_vm15, %v335_v60, 0 }
  0x91   : > { %1088 = vmatmul.mubr.msk.bf16.vlgmr.msra.gmra.mrb[0].mxu1 %vm400_vm1, %v1174_v43  ;;  %v661_v53 = vpop.permute.xlu1 %660  ;;  %856 = vmatprep.mubr.bf16.mxu0 %v1189_v0  ;;  %v523_v11 = vsel %vm404_vm0, %v357_v3, 0 }
  0x92   : > { %469 = vmatpush1.bf16.msra.mxu1 %v463_v50  ;;  %v659_v54 = vpop.permute.xlu0 %658  ;;  %500 = vmatprep.mubr.bf16.mxu1 %v1189_v0  ;;  %v665_v56 = vsel %vm334_vm12, %v661_v53, 0 }
  0x93   : > { %v662_v57 = vsel %vm334_vm12, %v659_v54, %v661_v53  ;;  %1095 = vmatprep.subr.msk.bf16.mxu1 %vm404_vm0, %v358_v51  ;;  %v668_v58 = vsel %vm1322_vm14, %v665_v56, 0 }
  0x94   : > { %v667_v59 = vsel %vm1333_vm15, %v662_v57, 0  ;;  %1113 = vmatprep.subr.msk.bf16.mxu0 %vm404_vm0, %v668_v58 }
  0x95   : > { %v819_v61 = vsel %vm404_vm0, %v667_v59, 0  ;;  %v364_v1 = vpop.permute.xlu1 %363 }
  0x96   : > { %825 = vmatpush1.bf16.msra.mxu0 %v819_v61  ;;  %v362_v2 = vpop.permute.xlu0 %361  ;;  %v370_v7 = vsel %vm365_vm2, %v364_v1, 0 }
  0x97   : > { %v389_v14 = vsel %vm1360_vm3, %v370_v7, 0  ;;  %v366_v18 = vsel %vm365_vm2, %v362_v2, %v364_v1 }
  0x98   : > { %v388_v19 = vsel %vm1365_vm4, %v366_v18, 0 }
  0x99   : > { %v672_v9 = vpop.permute.xlu1 %671  ;;  %v587_v22 = vsel %vm404_vm0, %v388_v19, 0 }
  0x9a   : > { %v670_v10 = vpop.permute.xlu0 %669  ;;  %v676_v12 = vsel %vm365_vm2, %v672_v9, 0 }
  0x9b   : > { %v673_v13 = vsel %vm365_vm2, %v670_v10, %v672_v9  ;;  %v679_v15 = vsel %vm1360_vm3, %v676_v12, 0 }
  0x9c   : > { %v678_v16 = vsel %vm1365_vm4, %v673_v13, 0  ;;  %1114 = vmatmul.mubr.msk.bf16.vlgmr.msra.gmra.mrb[0].mxu0 %vm400_vm1, %v1177_v5  ;;  %1118 = vmatprep.subr.msk.bf16.mxu0 %vm404_vm0, %v679_v15 }
  0x9d   : > { %1091 = vmatmul.mubr.msk.bf16.vlgmr.msra.gmra.mrb[0].mxu1 %vm400_vm1, %v1176_v4  ;;  %v883_v17 = vsel %vm404_vm0, %v678_v16, 0  ;;  %920 = vmatprep.mubr.bf16.mxu0 %v1189_v0 }
  0x9e   : > { %529 = vmatpush1.bf16.msra.mxu1 %v523_v11  ;;  %889 = vmatpush1.bf16.msra.mxu0 %v883_v17 }
  0x9f   : > { %1100 = vmatprep.subr.msk.bf16.mxu1 %vm404_vm0, %v389_v14  ;;  %560 = vmatprep.mubr.bf16.mxu1 %v1189_v0  ;;  %vm955_vm0 = vcmask 7168  }
  0xa8   : > { %1119 = vmatmul.mubr.msk.bf16.vlgmr.msra.gmra.mrb[0].mxu0 %vm400_vm1, %v1179_v21 }
  0xa9   : > { %1096 = vmatmul.mubr.msk.bf16.vlgmr.msra.gmra.mrb[0].mxu1 %vm400_vm1, %v1178_v20 }
  0xaa   : > { %593 = vmatpush1.bf16.msra.mxu1 %v587_v22  ;;  %624 = vmatprep.mubr.bf16.mxu1 %v1189_v0 }
  0xb5   : > { %1101 = vmatmul.mubr.msk.bf16.vlgmr.msra.gmra.mrb[0].mxu1 %vm400_vm1, %v1180_v23  ;;  %vm968_vm1 = vcmask 15368  }
 0x17b   : > { %v922_v24 = vpop.f32.mrb[0].mxu0 }
 0x17c   : > { %v924_v25 = vpop.f32.mrb[1].mxu0 }
 0x17d   : > { %v926_v26 = vpop.f32.mrb[2].mxu0 }
 0x17e   : > { %v928_v27 = vpop.f32.mrb[3].mxu0 }
 0x188   : > { %v626_v28 = vpop.f32.mrb[0].mxu1 }
 0x189   : > { %v1130_v29 = vadd.f32 %v922_v24, %v626_v28  ;;  %v628_v30 = vpop.f32.mrb[1].mxu1 }
 0x18a   : > { %v1131_v31 = vadd.f32 %v924_v25, %v628_v30  ;;  %v630_v32 = vpop.f32.mrb[2].mxu1 }
 0x18b   : > { %v1132_v33 = vadd.f32 %v926_v26, %v630_v32  ;;  %v632_v34 = vpop.f32.mrb[3].mxu1  ;;  %v958_v35 = vmul.f32 %v1130_v29, %v1130_v29 }
 0x18c   : > { %v1128_v0 = vpack.c.bf16 %v1131_v31, %v1130_v29  ;;  %v1133_v36 = vadd.f32 %v928_v27, %v632_v34  ;;  %v949_v37 = vadd.f32 %v1131_v31, %v1130_v29  ;;  %v959_v38 = vmul.f32 %v1131_v31, %v1131_v31 }
 0x18d   : > { %v960_v39 = vmul.f32 %v1132_v33, %v1132_v33 }
 0x18e   : > { %v1129_v40 = vpack.c.bf16 %v1133_v36, %v1132_v33  ;;  %950 = vadd.xlane.f32.xlu0 %v949_v37  ;;  %v952_v41 = vadd.f32 %v1133_v36, %v1132_v33  ;;  %v962_v42 = vadd.f32 %v959_v38, %v958_v35  ;;  %v961_v43 = vmul.f32 %v1133_v36, %v1133_v36 }
 0x18f   : > { %947 = vst [vmem:[%s252_s26] sm:$0xff] %v1128_v0 }
 0x190   : > { %953 = vadd.xlane.f32.xlu1 %v952_v41  ;;  %v965_v44 = vadd.f32 %v961_v43, %v960_v39  ;;  %948 = vst [vmem:[%s252_s26 + $0x8] sm:$0xff] %v1129_v40 }
 0x192   : > { %963 = vadd.xlane.f32.xlu0 %v962_v42 }
 0x196   : > { %966 = vadd.xlane.f32.xlu0 %v965_v44 }
 0x21b   : > { %v951_v45 = vpop.xlane.xlu0 %950 }
 0x21c   : > { %956 = vst.msk [vmem:[%s257_s28] sm:$0xff] %vm955_vm0, %v951_v45 }
 0x21d   : > { %v954_v46 = vpop.xlane.xlu1 %953 }
 0x21e   : > { %957 = vst.msk [vmem:[%s257_s28 + $0x8] sm:$0xff] %vm955_vm0, %v954_v46 }
 0x21f   : > { %v964_v47 = vpop.xlane.xlu0 %963 }
 0x220   : > { %969 = vst.msk [vmem:[%s257_s28] sm:$0xff] %vm968_vm1, %v964_v47 }
 0x223   : > { %v967_v48 = vpop.xlane.xlu0 %966 }
 0x224   : > { %970 = vst.msk [vmem:[%s257_s28 + $0x8] sm:$0xff] %vm968_vm1, %v967_v48 }
 0x225 PF: > { %s16_s18 = sadd.s32 1, %s1187_s18  }
 0x226   : > { %p13_p4 = scmp.ge.s32.totalorder %s16_s18, 4  }
 0x228   :  { %15 = sbr.rel (!%p13_p4) target bundleno = 1 (0x1), region = 87 }

// kernel: decoder_block_forward.3
= control target key start
LH: loop header
LB: loop body
LE: loop exit
PB: predicated region body
PF: predicated region fallthrough
CT: control target
= control target key end

     0   :  { %8 = vsyncpa [#allocation3], 0  ;;  %s700_s0 = inlined_call_operand.vmem [shape: f32[8,1,1], index: 0, kind: input, shape index: {}]   ;;  %s701_s1 = inlined_call_operand.vmem [shape: f32[8,1,1], index: 1, kind: input, shape index: {}]   ;;  %s702_s2 = inlined_call_operand.vmem [shape: bf16[8,32,32], index: 2, kind: input, shape index: {}]   ;;  %s703_s3 = inlined_call_operand.hbm [shape: f32[8,32,32], index: 3, kind: output, shape index: {}]  }
   0x1   :  { %10 = vsyncpa [#allocation3 + $0x1], 0  ;;  %s575_s12 = smov 0   ;;  %s577_s13 = smov 0  }
   0x2   :  { %s579_s14 = smov 0   ;;  %s581_s15 = smov 0  }
   0x3   :  { %s583_s16 = smov 0   ;;  %s585_s17 = smov 0  }
   0x4 LB: > { %s386_s18 = sadd.s32 4294967295, %s549_s17   ;;  %s387_s19 = sadd.s32 4294967294, %s549_s17   ;;  %s549_s17 = sphi %s585_s17, %s16_s17   ;;  %s545_s16 = sphi %s583_s16, %s710_s16   ;;  %s541_s15 = sphi %s581_s15, %s709_s15   ;;  %s537_s14 = sphi %s579_s14, %s708_s14   ;;  %s533_s13 = sphi %s577_s13, %s707_s13   ;;  %s529_s12 = sphi %s575_s12, %s706_s12  }
   0x5   : > { %s28_s20 = sadd.s32 1, %s545_s16  ;;  %s117_s21 = sadd.s32 1, %s537_s14 }
   0x6   : > { %p30_p0 = scmp.ge.s32.totalorder %s28_s20, 8  ;;  %p127_p1 = scmp.ne.s32.totalorder %s537_s14, %s533_s13 }
   0x7   : > { %p128_p2 = scmp.eq.s32.totalorder %s386_s18, 7  ;;  %p133_p3 = scmp.ne.s32.totalorder %s533_s13, %s529_s12 }
   0x8   : > { %s712_s20 = smov (%p30_p0, %s28_s20), 0  ;;  %p134_p5 = scmp.eq.s32.totalorder %s387_s19, 7 }
   0x9   : > { %p615_p4 = por %p128_p2, %p127_p1  ;;  %s112_s23 = ssub.s32 %s545_s16, %s712_s20 }
   0xa   : > { %p390_p6 = scmp.ge.s32.totalorder %s549_s17, 1  ;;  %p115_p7 = scmp.eq.s32.totalorder %s112_s23, 0 }
   0xb   : > { %p622_p8 = por %p134_p5, %p133_p3  ;;  %p177_p9 = scmp.lt.s32.totalorder %s549_s17, 9 }
   0xc   : > { %s628_s25 = scalar_select %p115_p7, %s537_s14, %s117_s21  }
   0xd   : > { %p178_p10 = pnand %p390_p6, %p177_p9 }
   0xe   : > { %p211_p11 = scmp.lt.s32.totalorder (!%p178_p10), %s541_s15, 7  ;;  %v551_v0 = vmov (!%p178_p10), 0   ;;  %s208_s10 = sand.u32 (!%p178_p10), 1, %s533_s13   ;;  %vm268_vm0 = vcmask (!%p178_p10), 261120  }
   0xf   : > { %181 = sbr.rel (%p178_p10) target bundleno = 178 (0xb2), region = 32  ;;  %470 = vset.pattern.permute.xlu0 (!%p178_p10), %v551_v0  ;;  %s391_s11 = sshll.u32 (!%p178_p10), %s208_s10, 5 }
  0x10   : > { %s402_s18 = sshll.u32 (!%p178_p10), %s541_s15, 9  ;;  %s210_s19 = scalar_lea.vmem (!%p178_p10), [#allocation2], %s391_s11 }
  0x11   : > { %s289_s21 = sshll.u32 (!%p178_p10), %s210_s19, 4  ;;  %s648_s27 = scalar_lea.hbm (!%p178_p10), %s703_s3, %s402_s18  ;;  %s650_s21 = int_to_ptr.vmem [resolvable:$true] %s289_s21 }
  0x12   : > { %s471_s28 = scalar_lea.vmem (!%p178_p10), %s650_s21, 512 }
  0x13   : > { %p472_p12 = scmp.ne.s32.totalorder (!%p178_p10), %s650_s21, %s471_s28 }
  0x15   : > { %p473_p13 = pnand (!%p178_p10), %p472_p12, %p615_p4 }
  0x16   : > { %s212_s26 = scalar_select %p211_p11, %s541_s15, 7 }
  0x17   : > { %s654_s15 = scalar_lea.sflag [#allocation3], %s208_s10  ;;  %p474_p0 = pneg %p473_p13 }
  0x18   : > { %s213_s29 = scalar_lea.vmem %s700_s0, %s212_s26  ;;  %s216_s5 = scalar_lea.vmem %s701_s1, %s212_s26 }
  0x19   : > { %v394_v1 = vld [vmem:[%s213_s29] ss:$0 sm:$0xff]  ;;  %s401_s6 = sshll.u32 %s212_s26, 4  ;;  %s552_s29 = smov [#allocation2]  }
  0x1a   : > { %243 = vperm.xlu0 %470, %v394_v1   ;;  %v395_v2 = vld [vmem:[%s216_s5] ss:$0 sm:$0xff]  ;;  %s225_s9 = scalar_lea.vmem %s702_s2, %s401_s6  ;;  %s475_s30 = sshll.u32 %s552_s29, 4  ;;  %s476_s30 = int_to_ptr.vmem [resolvable:$false] %s475_s30 }
  0x1b   : > { %v404_v3 = vld [vmem:[%s225_s9] sm:$0xff]   ;;  %v411_v4 = vld [vmem:[%s225_s9 + $0x8] sm:$0xff]   ;;  %s477_s4 = scalar_lea.vmem %s476_s30, 1024  ;;  %p478_p1 = scmp.lt.s32.totalorder %s650_s21, %s476_s30 }
  0x1c   : > { %v405_v5 = vunpack.c.l.bf16 %v404_v3  ;;  %v406_v6 = vunpack.c.h.bf16 %v404_v3  ;;  %v409_v7 = vunpack.c.l.bf16 %v411_v4  ;;  %v410_v8 = vunpack.c.h.bf16 %v411_v4  ;;  %p479_p2 = scmp.lt.s32.totalorder %s477_s4, %s471_s28 }
  0x1e   : > { %257 = vperm.xlu0 %470, %v395_v2   ;;  %p480_p3 = por %p479_p2, %p478_p1 }
  0x20   : > { %p481_p5 = pnand %p480_p3, %p474_p0 }
  0x99   : > { %v244_v9 = vpop.permute.xlu0 %243 }
  0x9a   : > { %v246_v10 = vmul.f32 %v405_v5, %v244_v9  ;;  %v247_v11 = vmul.f32 %v406_v6, %v244_v9  ;;  %v248_v12 = vmul.f32 %v409_v7, %v244_v9  ;;  %v249_v13 = vmul.f32 %v410_v8, %v244_v9 }
  0x9d   : > { %v258_v14 = vpop.permute.xlu0 %257 }
  0x9e   : > { %v260_v15 = vadd.f32 %v258_v14, %v246_v10  ;;  %v261_v16 = vadd.f32 %v258_v14, %v247_v11  ;;  %v262_v17 = vadd.f32 %v258_v14, %v248_v12  ;;  %v263_v18 = vadd.f32 %v258_v14, %v249_v13 }
  0xa0   : > { %v264_v19 = vmax.f32 %v260_v15, 0.0  ;;  %v265_v20 = vmax.f32 %v261_v16, 0.0  ;;  %v266_v21 = vmax.f32 %v262_v17, 0.0  ;;  %v267_v22 = vmax.f32 %v263_v18, 0.0 }
  0xa2   : > { %269 = vst.msk [vmem:[%s210_s19] sm:$0xff] %vm268_vm0, %v264_v19  ;;  %270 = vst.msk [vmem:[%s210_s19 + $0x8] sm:$0xff] %vm268_vm0, %v265_v20 }
  0xa3   : > { %271 = vst.msk [vmem:[%s210_s19 + $0x10] sm:$0xff] %vm268_vm0, %v266_v21  ;;  %272 = vst.msk [vmem:[%s210_s19 + $0x18] sm:$0xff] %vm268_vm0, %v267_v22 }
  0xa4   : > { %484 = shalt.err (!%p481_p5)
}
  0xa5   : > { %s485_s5 = scalar_lea.hbm %s648_s27, 512  ;;  %s489_s8 = scalar_lea.hbm %s703_s3, 4096 }
  0xa6   : > { %p486_p6 = scmp.ne.s32.totalorder %s648_s27, %s485_s5  ;;  %p490_p10 = scmp.lt.u32.totalorder %s648_s27, %s703_s3 }
  0xa7   : > { %p491_p11 = scmp.lt.u32.totalorder %s489_s8, %s485_s5  ;;  %p493_p13 = scmp.lt.u32.totalorder %s485_s5, %s648_s27 }
  0xa8   : > { %p487_p7 = pnand %p486_p6, %p615_p4 }
  0xa9   : > { %p492_p12 = por %p491_p11, %p490_p10 }
  0xaa   : > { %p488_p9 = pneg %p487_p7 }
  0xab   : > { %p494_p0 = por %p493_p13, %p492_p12 }
  0xad   : > { %p495_p1 = pnand %p494_p0, %p488_p9 }
  0xaf   : > { %498 = shalt.err (!%p495_p1)
}
  0xb0   : > { %s553_s11 = smov 128   ;;  %s554_s18 = smov 8  }
  0xb1   : > { %412 = dma.vmem_to_hbm [thread:$0]  (%p615_p4), %s650_s21, 512, %s648_s27, %s654_s15, %s553_s11, %s553_s11, %s554_s18  }
  0xb2 PF: > { %p418_p2 = scmp.ge.s32.totalorder %s549_s17, 2  ;;  %s304_s19 = sand.u32 1, %s529_s12  }
  0xb3   : > { %s305_s23 = scalar_lea.sflag [#allocation3], %s304_s19 }
  0xb4   : > { %p415_p3 = pnand %p418_p2, %p622_p8 }
  0xb6   : > { %524 = dma.done.wait (!%p415_p3), %s305_s23, 512  }
  0xb7   : > { %526 = vsyncadd (!%p415_p3), %s305_s23, 4294966784  ;;  %s16_s17 = sadd.s32 1, %s549_s17   ;;  %s706_s12 = smov %s533_s13 }
  0xb8   : > { %p13_p5 = scmp.ge.s32.totalorder %s16_s17, 10   ;;  %s707_s13 = smov %s537_s14 }
  0xb9   : > { %s708_s14 = smov %s628_s25  ;;  %s709_s15 = smov %s545_s16 }
  0xba   : > { %s710_s16 = smov %s712_s20  ;;  %15 = sbr.rel (!%p13_p5) target bundleno = 4 (0x4), region = 73 }
  0xc1   :  { %310 = vsyncpa [#allocation3], 1 }
  0xc2   :  { %312 = vsyncpa [#allocation3 + $0x1], 1 }

</bundles_post_ra>
